<compile_context>
chip_gen: v6e
topology: v6e:2x2x1
jax: 0.10.0
libtpu: 0.0.40
codegen_flags: <defaults>
</compile_context>

<pallas_src>
import jax
import jax.numpy as jnp
from jax.experimental import pallas as pl
from jax.experimental.pallas import tpu as pltpu


def _make_kernel(s_chunk):
    """Builds the kernel with a static sequence-chunk size baked in."""

    def kernel(x_ref, mask_ref, avg_ref, wu_t_ref, wv_t_ref, wt_ref, bt_ref,
               out_ref, scores_ref):
        TB, S, E = x_ref.shape
        A = wu_t_ref.shape[1]              # lane-dense (zero-padded) attn dim
        n_chunks = S // s_chunk

        wu_t = wu_t_ref[...]               # (E, A), x dtype
        wv_t = wv_t_ref[...]               # (E, A)
        wt = wt_ref[...]                   # (1, A) f32 (zero-padded)
        bt = bt_ref[0, 0]                  # scalar bias from SMEM

        # vlinear(avg_x): (TB, E) @ (E, A) -> (TB, A)           [MXU, f32 acc]
        q_proj = jnp.dot(avg_ref[...], wv_t, preferred_element_type=jnp.float32)

        def score_chunk(xc, cs):
            # ulinear(x): cs is a multiple of the dtype sublane pack, so this
            # reshape is a free re-tiling (no VMEM copy) feeding a 2-D MXU dot.
            xp = jnp.dot(xc.reshape(TB * cs, E), wu_t,
                         preferred_element_type=jnp.float32).reshape(TB, cs, A)
            h = jnp.tanh(xp + q_proj[:, None, :])               # (TB, cs, A)
            # tlinear(h).squeeze(-1): lane contraction; padded lanes are zero.
            return jnp.sum(h * wt[None, :, :], axis=-1) + bt    # (TB, cs) f32

        if n_chunks == 1:
            scores_ref[...] = score_chunk(x_ref[...], S)
        else:
            def body(c, carry):
                off = pl.multiple_of(c * s_chunk, s_chunk)      # 128-aligned
                xc = x_ref[:, pl.ds(off, s_chunk), :]
                scores_ref[:, pl.ds(off, s_chunk)] = score_chunk(xc, s_chunk)
                return carry
            jax.lax.fori_loop(0, n_chunks, body, 0)

        # masked_fill_(x_mask, -inf) + softmax(dim=1).  Fully masked rows give
        # NaN, matching the torch module's semantics.
        scores = jnp.where(mask_ref[...] != 0, -jnp.inf, scores_ref[...])
        m = jnp.max(scores, axis=1, keepdims=True)
        e = jnp.exp(scores - m)
        denom = jnp.sum(e, axis=1, keepdims=True)
        # EUP approximate reciprocal instead of a VPU divide (~1e-4 rel err).
        w = e * pl.reciprocal(denom, approx=True)               # (TB, S) f32

        # attn_weights.unsqueeze(1).bmm(x).squeeze(1): batched MXU dot with
        # f32 accumulation (weights cast to x dtype -- documented precision
        # trade-off when x is bf16), then collapse the singleton query dim
        # with a 3-D -> 2-D reduce so the store is a lane-dense (TB, E) slab.
        # (On v5e a VPU mul + sublane reduce may be preferable; not profiled.)
        pooled = jnp.einsum("bqs,bse->bqe", w[:, None, :].astype(x_ref.dtype),
                            x_ref[...], preferred_element_type=jnp.float32)
        out_ref[...] = jnp.sum(pooled, axis=1).astype(out_ref.dtype)

    return kernel


def _tpu_vmem_and_min_steps():
    """(physical VMEM bytes, preferred minimum grid steps) with safe fallbacks."""
    vmem_cap = 64 * 1024 * 1024            # conservative (v7x-sized) fallback
    try:
        vmem_cap = int(pltpu.get_tpu_info().vmem_capacity_bytes)
    except Exception:
        pass
    kind = ""
    try:
        kind = jax.devices()[0].device_kind.lower()
    except Exception:
        pass
    # Two-TensorCore chips want >=2 grid steps per core so the "parallel"
    # batch axis can be split; single-TC chips just need >=2 for DMA overlap.
    multi_tc = any(tag in kind for tag in ("v4", "v5p", "v7", "7x"))
    return vmem_cap, (4 if multi_tc else 2)


def _block_vmem_bytes(tb, S, E, A_pad, s_chunk, x_itemsize):
    # Streamed per-step blocks (double-buffered by the pipeline).
    stream = (tb * S * E * x_itemsize      # x tile
              + tb * S * 4                 # mask tile (int32)
              + tb * E * x_itemsize        # avg_x tile
              + tb * E * 4)                # output tile (f32)
    # Resident weights (constant index_map) still get the default 2 buffers.
    weights = 2 * E * A_pad * x_itemsize + A_pad * 4
    scratch = tb * S * 4                   # scores scratch
    # Live f32 intermediates: one S-chunk of x_proj/tanh, softmax temporaries,
    # cast attention weights, pooled result.
    interm = (2 * tb * s_chunk * A_pad * 4
              + 3 * tb * S * 4
              + tb * S * x_itemsize
              + tb * E * 4)
    return 2 * (stream + weights) + scratch + interm


def _choose_seq_chunk(S_pad):
    # Prefer ~256-row lane-aligned chunks so dynamic stores into the scores
    # scratch stay 128-aligned; short sequences are scored in one shot.
    for cs in (256, 128):
        if S_pad > cs and S_pad % cs == 0:
            return cs
    return S_pad


def _choose_batch_tile(B, fits, min_steps):
    # Valid tiles: multiples of 8 dividing B, or B itself (the (8,128) rule on
    # the (TB, S)/(TB, E) blocks).  Prefer tilings giving >= min_steps grid
    # steps, then >= 2 steps, then whatever is left; largest fitting tile wins.
    cands = sorted({tb for tb in range(8, B + 1, 8) if B % tb == 0} | {B},
                   reverse=True)
    tiers = ([tb for tb in cands if B // tb >= min_steps],
             [tb for tb in cands if 2 <= B // tb < min_steps],
             [tb for tb in cands if B // tb < 2])
    for tier in tiers:
        for tb in tier:
            if fits(tb):
                return tb
    # TODO(synk): for shapes where even the smallest batch tile exceeds the
    # VMEM budget (very long S*E), add an S grid axis with an online-softmax
    # (flash-style) accumulator instead of the one-shot softmax.
    return cands[-1]


@jax.jit
def attentive_pooling(x, x_mask, avg_x, wu, wv, wt, bt):
    """x: (B, S, E); x_mask: (B, S) bool, True = padded; avg_x: (B, E).
    wu, wv: (A, E) torch-style Linear weights (no bias); wt: (1, A); bt: (1, 1).
    Returns (B, E) f32."""
    B, S, E = x.shape
    A = wu.shape[0]
    itemsize = jnp.dtype(x.dtype).itemsize

    # Lane-pad attn dim to a multiple of 128 (exact: padded tlinear weights are
    # zero) and sublane-pad the sequence axis to the dtype pack (8 f32 /
    # 16 bf16) with the pad positions masked (exact: weight 0 after softmax).
    A_pad = ((A + 127) // 128) * 128
    sub = (8 * 4) // itemsize
    S_pad = ((S + sub - 1) // sub) * sub

    wu_t = jnp.pad(wu.T.astype(x.dtype), ((0, 0), (0, A_pad - A)))
    wv_t = jnp.pad(wv.T.astype(avg_x.dtype), ((0, 0), (0, A_pad - A)))
    wt_p = jnp.pad(wt.astype(jnp.float32), ((0, 0), (0, A_pad - A)))
    bt_s = bt.astype(jnp.float32).reshape(1, 1)

    x_p = jnp.pad(x, ((0, 0), (0, S_pad - S), (0, 0)))
    mask_i = jnp.pad(x_mask.astype(jnp.int32), ((0, 0), (0, S_pad - S)),
                     constant_values=1)

    s_chunk = _choose_seq_chunk(S_pad)
    vmem_cap, min_steps = _tpu_vmem_and_min_steps()
    budget = (vmem_cap * 3) // 8           # ~24 MiB on v7x, ~48 MiB on v5e/v6e
    fits = lambda tb: _block_vmem_bytes(tb, S_pad, E, A_pad, s_chunk,
                                        itemsize) <= budget
    TB = _choose_batch_tile(B, fits, min_steps)
    est = _block_vmem_bytes(TB, S_pad, E, A_pad, s_chunk, itemsize)
    vmem_limit = int(min(max(2 * est, 32 * 1024 * 1024), (vmem_cap * 7) // 8))

    return pl.pallas_call(
        _make_kernel(s_chunk),
        out_shape=jax.ShapeDtypeStruct((B, E), jnp.float32),
        grid=(B // TB,),
        in_specs=[
            pl.BlockSpec((TB, S_pad, E), lambda i: (i, 0, 0)),    # x tile
            pl.BlockSpec((TB, S_pad), lambda i: (i, 0)),          # mask tile
            pl.BlockSpec((TB, E), lambda i: (i, 0)),              # avg_x tile
            pl.BlockSpec((E, A_pad), lambda i: (0, 0)),           # wu^T resident
            pl.BlockSpec((E, A_pad), lambda i: (0, 0)),           # wv^T resident
            pl.BlockSpec((1, A_pad), lambda i: (0, 0)),           # wt resident
            pl.BlockSpec(memory_space=pltpu.MemorySpace.SMEM),    # bt scalar
        ],
        out_specs=pl.BlockSpec((TB, E), lambda i: (i, 0)),
        scratch_shapes=[pltpu.VMEM((TB, S_pad), jnp.float32)],
        compiler_params=pltpu.CompilerParams(
            dimension_semantics=("parallel",),
            vmem_limit_bytes=vmem_limit),
    )(x_p, mask_i, avg_x, wu_t, wv_t, wt_p, bt_s)


def reference(x, x_mask, avg_x, wu, wv, wt, bt):
    """Pure-JAX mirror of the PyTorch forward pass."""
    x_proj = x @ wu.T                                     # (B, S, A)
    q_proj = avg_x @ wv.T                                 # (B, A)
    scores = jnp.squeeze(jnp.tanh(x_proj + q_proj[:, None, :]) @ wt.T,
                         -1) + bt[0, 0]                   # (B, S)
    scores = jnp.where(x_mask, -jnp.inf, scores)
    w = jax.nn.softmax(scores, axis=1)
    return jnp.einsum("bs,bse->be", w, x)                 # (B, E)


if __name__ == "__main__":
    B, S, E, A = 2, 8, 32, 16  # batch, seq_len, encoder_embed_dim, attn_dim

    key = jax.random.PRNGKey(0)
    k1, k2, k3, k4, k5, k6 = jax.random.split(key, 6)

    x = jax.random.normal(k1, (B, S, E), jnp.float32)
    avg_x = jax.random.normal(k2, (B, E), jnp.float32)
    lengths = jnp.array([8, 5], jnp.int32)
    x_mask = jnp.arange(S)[None, :] >= lengths[:, None]   # True = padded

    # Deterministic synthetic parameters (ulinear/vlinear: (attn_dim, embed_dim)
    # no-bias Linears; tlinear: (1, attn_dim) + bias).  The module's init zeroes
    # tlinear.weight, which would make the score path degenerate, so use small
    # non-zero values to exercise it.
    wu = 0.05 * jax.random.normal(k3, (A, E), jnp.float32)
    wv = 0.05 * jax.random.normal(k4, (A, E), jnp.float32)
    wt = 0.50 * jax.random.normal(k5, (1, A), jnp.float32)
    bt = 0.10 * jax.random.normal(k6, (1, 1), jnp.float32)

    out = attentive_pooling(x, x_mask, avg_x, wu, wv, wt, bt)
    out = jax.block_until_ready(out)

    ref = reference(x, x_mask, avg_x, wu, wv, wt, bt)
    assert out.shape == (B, E)
    # Tolerance loosened slightly (2e-3) because the softmax normalization uses
    # the EUP approximate reciprocal (~1e-4 relative error vs. exact divide).
    err = jnp.max(jnp.abs(out - ref))
    assert jnp.allclose(out, ref, atol=2e-3, rtol=2e-3), f"max abs err {err}"
    print("KERNEL_OK")
</pallas_src>

<mosaic_0001>
module attributes {stable_mosaic.version = 11 : i64} {
  func.func @kernel(%arg0: i32, %arg1: memref<2x8x32xf32, #tpu.memory_space<vmem>>, %arg2: memref<2x8xi32, #tpu.memory_space<vmem>>, %arg3: memref<2x32xf32, #tpu.memory_space<vmem>>, %arg4: memref<32x128xf32, #tpu.memory_space<vmem>>, %arg5: memref<32x128xf32, #tpu.memory_space<vmem>>, %arg6: memref<1x128xf32, #tpu.memory_space<vmem>>, %arg7: memref<1x1xf32, #tpu.memory_space<smem>>, %arg8: memref<2x32xf32, #tpu.memory_space<vmem>>, %arg9: memref<2x8xf32, #tpu.memory_space<vmem>>) attributes {dimension_semantics = [#tpu.dimension_semantics<parallel>], iteration_bounds = array<i64: 1>, scalar_prefetch = 0 : i64, scratch_operands = 1 : i64, tpu.core_type = #tpu.core_type<tc>, window_params = [{transform_indices = @transform_0, window_bounds = array<i64: 2, 8, 32>}, {transform_indices = @transform_1, window_bounds = array<i64: 2, 8>}, {transform_indices = @transform_2, window_bounds = array<i64: 2, 32>}, {pipeline_mode = #tpu.pipeline_mode<synchronous>, transform_indices = @transform_3, window_bounds = array<i64: 32, 128>}, {pipeline_mode = #tpu.pipeline_mode<synchronous>, transform_indices = @transform_4, window_bounds = array<i64: 32, 128>}, {pipeline_mode = #tpu.pipeline_mode<synchronous>, transform_indices = @transform_5, window_bounds = array<i64: 1, 128>}, {transform_indices = @transform_6, window_bounds = array<i64: 1, 1>}, {transform_indices = @transform_7, window_bounds = array<i64: 2, 32>}]} {
    %c0 = arith.constant 0 : index
    %c0_0 = arith.constant 0 : index
    %0 = vector.load %arg4[%c0, %c0_0] : memref<32x128xf32, #tpu.memory_space<vmem>>, vector<32x128xf32>
    %c0_1 = arith.constant 0 : index
    %c0_2 = arith.constant 0 : index
    %1 = vector.load %arg5[%c0_1, %c0_2] : memref<32x128xf32, #tpu.memory_space<vmem>>, vector<32x128xf32>
    %c0_3 = arith.constant 0 : index
    %c0_4 = arith.constant 0 : index
    %2 = vector.load %arg6[%c0_3, %c0_4] : memref<1x128xf32, #tpu.memory_space<vmem>>, vector<1x128xf32>
    %c0_5 = arith.constant 0 : index
    %c0_6 = arith.constant 0 : index
    %3 = memref.load %arg7[%c0_5, %c0_6] : memref<1x1xf32, #tpu.memory_space<smem>>
    %c0_7 = arith.constant 0 : index
    %c0_8 = arith.constant 0 : index
    %4 = vector.load %arg3[%c0_7, %c0_8] : memref<2x32xf32, #tpu.memory_space<vmem>>, vector<2x32xf32>
    %cst = arith.constant dense<0.000000e+00> : vector<2x128xf32>
    %5 = tpu.matmul %4, %1, %cst {dimension_numbers = #tpu.dot_dimension_numbers<[1], [0], [0], [1], [0, 0, 1, 1], [], []>} : vector<2x32xf32>, vector<32x128xf32>, vector<2x128xf32> -> vector<2x128xf32>
    %c0_9 = arith.constant 0 : index
    %c0_10 = arith.constant 0 : index
    %c0_11 = arith.constant 0 : index
    %6 = vector.load %arg1[%c0_9, %c0_10, %c0_11] : memref<2x8x32xf32, #tpu.memory_space<vmem>>, vector<2x8x32xf32>
    %7 = vector.shape_cast %6 : vector<2x8x32xf32> to vector<16x32xf32>
    %cst_12 = arith.constant dense<0.000000e+00> : vector<16x128xf32>
    %8 = tpu.matmul %7, %0, %cst_12 {dimension_numbers = #tpu.dot_dimension_numbers<[1], [0], [0], [1], [0, 0, 1, 1], [], []>} : vector<16x32xf32>, vector<32x128xf32>, vector<16x128xf32> -> vector<16x128xf32>
    %9 = vector.shape_cast %8 : vector<16x128xf32> to vector<2x8x128xf32>
    %10 = vector.shape_cast %5 : vector<2x128xf32> to vector<2x1x128xf32>
    %11 = vector.broadcast %10 : vector<2x1x128xf32> to vector<2x8x128xf32>
    %12 = arith.addf %9, %11 : vector<2x8x128xf32>
    %13 = math.tanh %12 : vector<2x8x128xf32>
    %14 = vector.shape_cast %2 : vector<1x128xf32> to vector<1x1x128xf32>
    %15 = vector.broadcast %14 : vector<1x1x128xf32> to vector<2x8x128xf32>
    %16 = arith.mulf %13, %15 : vector<2x8x128xf32>
    %cst_13 = arith.constant dense<0.000000e+00> : vector<2x8xf32>
    %17 = vector.multi_reduction <add>, %16, %cst_13 [2] : vector<2x8x128xf32> to vector<2x8xf32>
    %18 = vector.broadcast %3 : f32 to vector<2x8xf32>
    %19 = arith.addf %17, %18 : vector<2x8xf32>
    %c0_14 = arith.constant 0 : index
    %c0_15 = arith.constant 0 : index
    %20 = vector.load %arg9[%c0_14, %c0_15] : memref<2x8xf32, #tpu.memory_space<vmem>>, vector<2x8xf32>
    tpu.vector_store %arg9[%c0_14, %c0_15], %19 {strides = array<i32>} : memref<2x8xf32, #tpu.memory_space<vmem>>, vector<2x8xf32>,
    %c0_16 = arith.constant 0 : index
    %c0_17 = arith.constant 0 : index
    %21 = vector.load %arg2[%c0_16, %c0_17] : memref<2x8xi32, #tpu.memory_space<vmem>>, vector<2x8xi32>
    %c0_i32 = arith.constant 0 : i32
    %22 = vector.broadcast %c0_i32 : i32 to vector<2x8xi32>
    %23 = arith.cmpi ne, %21, %22 : vector<2x8xi32>
    %c0_18 = arith.constant 0 : index
    %c0_19 = arith.constant 0 : index
    %24 = vector.load %arg9[%c0_18, %c0_19] : memref<2x8xf32, #tpu.memory_space<vmem>>, vector<2x8xf32>
    %cst_20 = arith.constant 0xFF800000 : f32
    %25 = vector.broadcast %cst_20 : f32 to vector<2x8xf32>
    %26 = arith.select %23, %25, %24 : vector<2x8xi1>, vector<2x8xf32>
    %cst_21 = arith.constant dense<0xFF800000> : vector<2xf32>
    %27 = vector.multi_reduction <maximumf>, %26, %cst_21 [1] : vector<2x8xf32> to vector<2xf32>
    %28 = vector.shape_cast %27 : vector<2xf32> to vector<2x1xf32>
    %29 = vector.broadcast %28 : vector<2x1xf32> to vector<2x8xf32>
    %30 = arith.subf %26, %29 : vector<2x8xf32>
    %31 = math.exp %30 : vector<2x8xf32>
    %cst_22 = arith.constant dense<0.000000e+00> : vector<2xf32>
    %32 = vector.multi_reduction <add>, %31, %cst_22 [1] : vector<2x8xf32> to vector<2xf32>
    %33 = vector.shape_cast %32 : vector<2xf32> to vector<2x1xf32>
    %34 = tpu.reciprocal %33 {approx = true} : vector<2x1xf32> -> vector<2x1xf32>
    %35 = vector.broadcast %34 : vector<2x1xf32> to vector<2x8xf32>
    %36 = arith.mulf %31, %35 : vector<2x8xf32>
    %37 = vector.shape_cast %36 : vector<2x8xf32> to vector<2x1x8xf32>
    %c0_23 = arith.constant 0 : index
    %c0_24 = arith.constant 0 : index
    %c0_25 = arith.constant 0 : index
    %38 = vector.load %arg1[%c0_23, %c0_24, %c0_25] : memref<2x8x32xf32, #tpu.memory_space<vmem>>, vector<2x8x32xf32>
    "tpu.trace_start"() <{level = 10 : i32, message = "bqs,bse->bqe"}> : () -> ()
    %cst_26 = arith.constant dense<0.000000e+00> : vector<2x1x32xf32>
    %39 = tpu.matmul %37, %38, %cst_26 {dimension_numbers = #tpu.dot_dimension_numbers<[2], [1], [1], [2], [0, 0, 0, 1, 1, 2], [0], [0]>} : vector<2x1x8xf32>, vector<2x8x32xf32>, vector<2x1x32xf32> -> vector<2x1x32xf32>
    "tpu.trace_stop"() : () -> ()
    %cst_27 = arith.constant dense<0.000000e+00> : vector<2x32xf32>
    %40 = vector.multi_reduction <add>, %39, %cst_27 [1] : vector<2x1x32xf32> to vector<2x32xf32>
    %c0_28 = arith.constant 0 : index
    %c0_29 = arith.constant 0 : index
    %41 = vector.load %arg8[%c0_28, %c0_29] : memref<2x32xf32, #tpu.memory_space<vmem>>, vector<2x32xf32>
    tpu.vector_store %arg8[%c0_28, %c0_29], %40 {strides = array<i32>} : memref<2x32xf32, #tpu.memory_space<vmem>>, vector<2x32xf32>,
    return
  }
  func.func @transform_0(%arg0: i32) -> (i32, i32, i32) {
    %c0_i32 = arith.constant 0 : i32
    %c0_i32_0 = arith.constant 0 : i32
    %c0_i32_1 = arith.constant 0 : i32
    return %arg0, %c0_i32, %c0_i32_0 : i32, i32, i32
  }
  func.func @transform_1(%arg0: i32) -> (i32, i32) {
    %c0_i32 = arith.constant 0 : i32
    %c0_i32_0 = arith.constant 0 : i32
    return %arg0, %c0_i32 : i32, i32
  }
  func.func @transform_2(%arg0: i32) -> (i32, i32) {
    %c0_i32 = arith.constant 0 : i32
    %c0_i32_0 = arith.constant 0 : i32
    return %arg0, %c0_i32 : i32, i32
  }
  func.func @transform_3(%arg0: i32) -> (i32, i32) {
    %c0_i32 = arith.constant 0 : i32
    %c0_i32_0 = arith.constant 0 : i32
    %c0_i32_1 = arith.constant 0 : i32
    return %c0_i32, %c0_i32_0 : i32, i32
  }
  func.func @transform_4(%arg0: i32) -> (i32, i32) {
    %c0_i32 = arith.constant 0 : i32
    %c0_i32_0 = arith.constant 0 : i32
    %c0_i32_1 = arith.constant 0 : i32
    return %c0_i32, %c0_i32_0 : i32, i32
  }
  func.func @transform_5(%arg0: i32) -> (i32, i32) {
    %c0_i32 = arith.constant 0 : i32
    %c0_i32_0 = arith.constant 0 : i32
    %c0_i32_1 = arith.constant 0 : i32
    return %c0_i32, %c0_i32_0 : i32, i32
  }
  func.func @transform_6(%arg0: i32) -> (i32, i32) {
    %c0_i32 = arith.constant 0 : i32
    %c0_i32_0 = arith.constant 0 : i32
    %c0_i32_1 = arith.constant 0 : i32
    return %c0_i32, %c0_i32_0 : i32, i32
  }
  func.func @transform_7(%arg0: i32) -> (i32, i32) {
    %c0_i32 = arith.constant 0 : i32
    %c0_i32_0 = arith.constant 0 : i32
    return %arg0, %c0_i32 : i32, i32
  }
}

</mosaic_0001>

<bundles_post_ra>
// kernel: attentive_pooling.1
= control target key start
LH: loop header
LB: loop body
LE: loop exit
PB: predicated region body
PF: predicated region fallthrough
CT: control target
= control target key end

     0   :  { %v560_v2 = vmov 0.0   ;;  %s654_s0 = inlined_call_operand.vmem [shape: f32[2,8,32], index: 0, kind: input, shape index: {}]   ;;  %s655_s1 = inlined_call_operand.vmem [shape: s32[2,8], index: 1, kind: input, shape index: {}]   ;;  %s656_s2 = inlined_call_operand.vmem [shape: f32[2,32], index: 2, kind: input, shape index: {}]   ;;  %s657_s3 = inlined_call_operand.vmem [shape: f32[32,128], index: 3, kind: input, shape index: {}]   ;;  %s658_s4 = inlined_call_operand.vmem [shape: f32[32,128], index: 4, kind: input, shape index: {}]   ;;  %s659_s5 = inlined_call_operand.vmem [shape: f32[1,128], index: 5, kind: input, shape index: {}]   ;;  %s660_s6 = inlined_call_operand.<no memory space> [shape: f32[1,1], index: 6, kind: input, shape index: {}]   ;;  %s661_s7 = inlined_call_operand.hbm [shape: f32[2,32], index: 7, kind: output, shape index: {}]  }
   0x1   :  { %v35_v0 = vld [vmem:[%s658_s4 + $0x18] sm:$0xff]  ;;  %494 = vmatprep.subr.mxu0 %v560_v2  ;;  %v34_v3 = vld [vmem:[%s658_s4 + $0x10] sm:$0xff]  ;;  %v29_v5 = vld [vmem:[%s657_s3 + $0x8] sm:$0xff] }
   0x2   :  { %v31_v1 = vld [vmem:[%s657_s3 + $0x18] sm:$0xff]  ;;  %v30_v4 = vld [vmem:[%s657_s3 + $0x10] sm:$0xff]  ;;  %495 = vmatpush3.msra.mxu0 %v35_v0  ;;  %v33_v6 = vld [vmem:[%s658_s4 + $0x8] sm:$0xff] }
   0x3   :  { %505 = vmatprep.subr.mxu1 %v31_v1  ;;  %496 = vmatprep.subr.mxu0 %v560_v2 }
   0x4   :  { %506 = vmatpush3.msra.mxu1 %v31_v1 }
   0x5   :  { %507 = vmatprep.subr.mxu1 %v30_v4 }
   0x6   :  { %13 = vsyncpa [#allocation5], 0  ;;  %497 = vmatpush3.msra.mxu0 %v34_v3  ;;  %508 = vmatpush3.msra.mxu1 %v30_v4  ;;  %v32_v7 = vld [vmem:[%s658_s4] sm:$0xff]  ;;  %vm561_vm0 = vmmov 0   ;;  %vm39_vm1 = vcmask 261120   ;;  %v114_v11 = vld [vmem:[%s654_s0 + $0x8] sm:$0xff]  ;;  %v200_v12 = vlaneseq  ;;  %v245_v38 = vstv %s660_s6 }
   0x7   :  { %498 = vmatprep.subr.mxu0 %v560_v2  ;;  %509 = vmatprep.subr.mxu1 %v29_v5  ;;  %v28_v8 = vld [vmem:[%s657_s3] sm:$0xff]  ;;  %v562_v16 = vmov 1966171168   ;;  %vm260_vm2 = vcmask 1041409   ;;  %vm263_vm3 = vcmask 58368   ;;  %vm305_vm5 = vcmask 64512  }
   0x8   :  { %499 = vmatpush3.msra.mxu0 %v33_v6  ;;  %502 = vmatprep.mubr.msk.f32.mxu0 %vm561_vm0, %v560_v2  ;;  %v38_v9 = vld [vmem:[%s656_s2] sm:$0x3]  ;;  %v201_v13 = vshrl.u32 %v200_v12, 7  ;;  %v251_v14 = vand.u32 127, %v200_v12  ;;  %v198_v17 = vunpack.c.l.s4 %v562_v16  ;;  %vm457_vm6 = vcmask 254976  }
   0x9   :  { %500 = vmatprep.subr.mxu0 %v560_v2  ;;  %510 = vmatpush3.msra.mxu1 %v29_v5  ;;  %v113_v10 = vld [vmem:[%s654_s0] sm:$0xff] }
   0xa   :  { %501 = vmatpush3.msra.mxu0 %v32_v7  ;;  %511 = vmatprep.subr.mxu1 %v28_v8  ;;  %v254_v15 = vsub.s32 %v251_v14, %v201_v13  ;;  %v199_v18 = vunpack.c.0.s8 %v198_v17  ;;  %v221_v22 = vsub.s32 0, %v201_v13  ;;  %v476_v33 = vld [vmem:[%s659_s5] ss:$0 sm:$0xff] }
   0xb   :  { %503 = vmatmul.mubr.msk.f32.vlgmr.msra.gmra.mxu0 %vm39_vm1, %v38_v9  ;;  %512 = vmatpush3.msra.mxu1 %v28_v8  ;;  %v265_v46 = vld [vmem:[%s655_s1] sm:$0x3]  ;;  %s563_s1 = smov [#allocation4]  }
   0xc   :  { %513 = vmatprep.mubr.msk.f32.mxu1 %vm39_vm1, %v113_v10  ;;  %521 = vmatprep.subr.mxu1 %v560_v2  ;;  %v202_v19 = vsub.s32 %v199_v18, %v201_v13  ;;  %vm266_vm4 = vcmp.ne.s32.totalorder %v265_v46, 0  ;;  %s465_s6 = sshll.u32 %s563_s1, 4  ;;  %s466_s6 = int_to_ptr.vmem [resolvable:$true] %s465_s6 }
   0xd   :  { %514 = vmatmul.mubr.msk.f32.vlgmr.msra.gmra.mxu1 %vm39_vm1, %v114_v11  ;;  %516 = vmatprep.subr.mxu0 %v560_v2  ;;  %s538_s24 = scalar_lea.vmem %s466_s6, 32  ;;  %p543_p1 = scmp.lt.s32.totalorder %s466_s6, %s466_s6 }
   0xe   :  { %522 = vmatpush3.msra.mxu1 %v114_v11  ;;  %517 = vmatpush3.msra.mxu0 %v113_v10  ;;  %p539_p0 = scmp.ne.s32.totalorder %s466_s6, %s538_s24  ;;  %p544_p2 = scmp.lt.s32.totalorder %s538_s24, %s538_s24 }
   0xf   :  { %518 = vmatprep.mubr.msk.f32.mxu0 %vm561_vm0, %v560_v2  ;;  %523 = vmatprep.mubr.msk.f32.mxu1 %vm561_vm0, %v560_v2 }
  0x10   :  { %p545_p3 = por %p544_p2, %p543_p1 }
  0x12   :  { %p546_p4 = pnand %p545_p3, %p539_p0 }
  0xcb   :  { %v109_v20 = vpop.f32.mrf.mxu0 }
  0xcc   :  { %v203_v21 = vrot.slane %v109_v20, %v202_v19 }
  0xcd   :  { %v504_v23 = vpop.f32.mrf.mxu0  ;;  %v515_v24 = vpop.f32.mrf.mxu1 }
  0xce   :  { %v204_v25 = vcombine.high %v203_v21, %v203_v21  ;;  %v211_v26 = vrot.slane %v203_v21, %v202_v19 }
  0xcf   :  { %v187_v29 = vpop.f32.mrf.mxu1 }
  0xd0   :  { %v218_v27 = vrot.slane %v204_v25, %v202_v19  ;;  %v222_v28 = vrot.slane %v211_v26, %v221_v22 }
  0xd2   :  { %v226_v30 = vrot.slane %v218_v27, %v221_v22  ;;  %v229_v31 = vadd.f32 %v222_v28, %v187_v29 }
  0xd4   :  { %v230_v32 = vadd.f32 %v515_v24, %v226_v30  ;;  %530 = vtanh.f32 %v229_v31 }
  0xd6   :  { %532 = vtanh.f32 %v230_v32 }
  0xe1   :  { %v531_v34 = vpop.eup %530 }
  0xe2   :  { %v239_v35 = vmul.f32 %v531_v34, %v476_v33 }
  0xe3   :  { %v533_v36 = vpop.eup %532 }
  0xe4   :  { %241 = vadd.xlane.f32.xlu0 %v239_v35  ;;  %v240_v37 = vmul.f32 %v533_v36, %v476_v33 }
  0xe8   :  { %243 = vadd.xlane.f32.xlu0 %v240_v37 }
 0x16d   :  { %v242_v39 = vpop.xlane.xlu0 %241 }
 0x16e   :  { %v246_v40 = vadd.f32 %v245_v38, %v242_v39 }
 0x170   :  { %v255_v43 = vrot.slane %v246_v40, %v254_v15 }
 0x171   :  { %v244_v41 = vpop.xlane.xlu0 %243 }
 0x172   :  { %v247_v42 = vadd.f32 %v245_v38, %v244_v41 }
 0x174   :  { %v259_v44 = vrot.slane %v247_v42, %v254_v15 }
 0x176   :  { %v261_v45 = vsel %vm260_vm2, %v259_v44, %v255_v43 }
 0x177   :  { %264 = vst.msk [vmem:[#allocation2] sm:$0x3] %vm263_vm3, %v261_v45 }
 0x17e   :  { %v267_v47 = vld [vmem:[#allocation2] sm:$0x3] }
 0x17f   :  { %v268_v48 = vsel %vm266_vm4, -inf, %v267_v47 }
 0x180   :  { %v269_v49 = vsel %vm263_vm3, %v268_v48, -inf }
 0x181   :  { %270 = vmax.xlane.f32.xlu1 %v269_v49 }
 0x20a   :  { %v271_v50 = vpop.xlane.xlu1 %270 }
 0x20b   :  { %v272_v51 = vsub.f32 %v268_v48, %v271_v50 }
 0x20d   :  { %v273_v52 = vmul.f32 1.442695, %v272_v51 }
 0x20f   :  { %534 = vpow2.f32 %v273_v52 }
 0x21c   :  { %v535_v53 = vpop.eup %534 }
 0x21d   :  { %v275_v54 = vsel %vm263_vm3, %v535_v53, 0.0 }
 0x21e   :  { %276 = vadd.xlane.f32.xlu1 %v275_v54 }
 0x2a7   :  { %v277_v55 = vpop.xlane.xlu1 %276 }
 0x2a8   :  { %536 = vrcp.f32 %v277_v55 }
 0x2b5   :  { %v537_v56 = vpop.eup %536 }
 0x2b6   :  { %v279_v57 = vmul.f32 %v537_v56, %v535_v53 }
 0x2b8   :  { %v287_v58 = vrot.slane %v279_v57, %v202_v19 }
 0x2ba   :  { %v295_v59 = vrot.slane %v287_v58, %v202_v19  ;;  %v288_v60 = vcombine.high %v287_v58, %v287_v58 }
 0x2bc   :  { %519 = vmatmul.mubr.msk.f32.vlgmr.msra.gmra.mxu0 %vm305_vm5, %v295_v59  ;;  %v302_v61 = vrot.slane %v288_v60, %v202_v19 }
 0x2be   :  { %524 = vmatmul.mubr.msk.f32.vlgmr.msra.gmra.mxu1 %vm305_vm5, %v302_v61 }
 0x37c   :  { %v374_v62 = vpop.f32.mrf.mxu0 }
 0x37e   :  { %v520_v63 = vpop.f32.mrf.mxu0  ;;  %v446_v0 = vpop.f32.mrf.mxu1 }
 0x37f   :  { %v454_v1 = vrot.slane %v446_v0, 7 }
 0x380   :  { %v525_v2 = vpop.f32.mrf.mxu1 }
 0x381   :  { %v455_v3 = vsel %vm260_vm2, %v454_v1, %v374_v62 }
 0x382   :  { %458 = vst.msk [vmem:[#allocation4] sm:$0x3] %vm457_vm6, %v455_v3 }
 0x383   :  { %549 = shalt.err (!%p546_p4)
}
 0x384   :  { %468 = dma.vmem_to_hbm [thread:$0]  %s466_s6, 32, %s661_s7, [#allocation5]  }
 0x385   :  { %558 = dma.done.wait [#allocation5], 32  }
 0x386   :  { %559 = vsyncadd [#allocation5], 4294967264 }
 0x387   :  { %472 = vsyncpa [#allocation5], 1 }

</bundles_post_ra>
